<compile_context>
chip_gen: v5e
topology: v5e:2x2
jax: 0.10.0
libtpu: 0.0.40
codegen_flags: <defaults>
</compile_context>

<pallas_src>
import math

import jax
import jax.numpy as jnp
from jax.experimental import pallas as pl
from jax.experimental.pallas import tpu as pltpu


# 4096 rows * 128 lanes * 4 B = 2 MiB output tile; ~6-7 MiB total with double
# buffering -> comfortable under the 32 MiB scoped / 64 MiB physical VMEM on v7x.
_MAX_ROWS_PER_TILE = 4096


def _round_up(x: int, m: int) -> int:
    return -(-x // m) * m


def _pos_enc_kernel_packed(nl_ref, fe_ref, ph_ref, out_ref):
    """Lane-dense packed kernel: each output row holds G batch embeddings.

    nl_ref:  (TB, G)  f32   G noise levels per packed row
    fe_ref:  (G, W)   f32   expansion matrix with frequencies folded in:
                            fe[g, l] = freq[(l % dim) % count] if l // dim == g else 0
    ph_ref:  (1, W)   f32   per-lane phase: 0 on the sin half, pi/2 on the cos half
    out_ref: (TB, W)        W = G * dim (== 128 when dim divides 128)
    """
    nl = nl_ref[...].astype(jnp.float32)                                   # (TB, G)
    # Tiny matmul on the otherwise-idle MXU: broadcasts each noise level across
    # its dim lanes and applies the hoisted frequency table in one shot.
    arg = jnp.dot(nl, fe_ref[...], preferred_element_type=jnp.float32)     # (TB, W)
    arg = arg + ph_ref[...]
    # sin(x + pi/2) == cos(x): one EUP op per output element, no concatenate,
    # one full-width (lane-dense) store.
    out_ref[...] = jnp.sin(arg).astype(out_ref.dtype)


def _pos_enc_kernel_wide(nl_ref, fr_ref, ph_ref, out_ref):
    """Fallback when dim does not pack into 128 lanes (dim >= 128 or 128 % dim != 0).

    nl_ref:  (TB, 1) f32; fr_ref/ph_ref: (1, dim) f32; out_ref: (TB, dim).
    """
    nl = nl_ref[...].astype(jnp.float32)                                   # (TB, 1)
    arg = nl * fr_ref[...] + ph_ref[...]                                   # (TB, dim)
    out_ref[...] = jnp.sin(arg).astype(out_ref.dtype)


def positional_encoding(noise_level: jax.Array, dim: int) -> jax.Array:
    """noise_level: (B,) -> (B, dim) sinusoidal embedding (matches the PyTorch module)."""
    assert noise_level.ndim == 1, "noise_level must be rank-1 (one scalar per batch element)"
    assert dim % 2 == 0, "dim must be even"

    count = dim // 2
    b = noise_level.shape[0]
    out_dtype = noise_level.dtype

    # Lane-dense packing factor: G batch elements per 128-lane row.
    if dim < 128 and 128 % dim == 0:
        g = 128 // dim
    else:
        g = 1
    w = g * dim

    # ---- hoisted per-lane tables (f32, built once in the wrapper) -------------
    lane = jnp.arange(w, dtype=jnp.int32)
    chan = lane % dim                                   # channel within one embedding
    freq_idx = chan % count
    # exp(-ln(1e4) * k / count), divide folded into one constant multiply.
    freqs = jnp.exp(jnp.float32(-math.log(10000.0) / count)
                    * freq_idx.astype(jnp.float32))                         # (w,)
    phase = jnp.where(chan < count,
                      jnp.float32(0.0),
                      jnp.float32(math.pi / 2.0)).astype(jnp.float32)[None, :]  # (1, w)

    # ---- batch packing / tiling ----------------------------------------------
    nl32 = noise_level.astype(jnp.float32)
    rows_needed = -(-b // g)
    if rows_needed <= _MAX_ROWS_PER_TILE:
        rows = _round_up(rows_needed, 8)
        tb = rows
    else:
        tb = _MAX_ROWS_PER_TILE
        rows = _round_up(rows_needed, tb)
    b_pad = rows * g
    if b_pad != b:
        nl32 = jnp.pad(nl32, (0, b_pad - b))
    nl_packed = nl32.reshape(rows, g)                   # lane-packed noise levels

    if g > 1:
        owner = lane // dim                                                  # (w,)
        fe = jnp.where(owner[None, :] == jnp.arange(g, dtype=jnp.int32)[:, None],
                       freqs[None, :], jnp.float32(0.0)).astype(jnp.float32)  # (g, w)
        kernel = _pos_enc_kernel_packed
        table = fe
        table_block = (g, w)
    else:
        kernel = _pos_enc_kernel_wide
        table = freqs[None, :]                                               # (1, w)
        table_block = (1, w)

    grid = (rows // tb,)

    out_packed = pl.pallas_call(
        kernel,
        out_shape=jax.ShapeDtypeStruct((rows, w), out_dtype),
        grid=grid,
        in_specs=[
            pl.BlockSpec((tb, g), lambda i: (i, 0)),
            pl.BlockSpec(table_block, lambda i: (0, 0)),
            pl.BlockSpec((1, w), lambda i: (0, 0)),
        ],
        out_specs=pl.BlockSpec((tb, w), lambda i: (i, 0)),
        compiler_params=pltpu.CompilerParams(dimension_semantics=("parallel",)),
    )(nl_packed, table, phase)

    # (rows, G*dim) -> (B_pad, dim) is row-major compatible: free reshape.
    out = out_packed.reshape(b_pad, dim)
    if b_pad != b:
        out = out[:b]
    return out


def _reference(noise_level: jax.Array, dim: int) -> jax.Array:
    count = dim // 2
    step = jnp.arange(count, dtype=jnp.float32) / count
    enc = noise_level.astype(jnp.float32)[:, None] * jnp.exp(-math.log(10000.0) * step)[None, :]
    out = jnp.concatenate([jnp.sin(enc), jnp.cos(enc)], axis=-1)
    return out.astype(noise_level.dtype)


if __name__ == "__main__":
    key = jax.random.PRNGKey(0)
    k0, k1 = jax.random.split(key)

    pe = jax.jit(positional_encoding, static_argnames=("dim",))

    # Packed (lane-dense) path: dim=32 -> G=4 batch elements per 128-lane row.
    B, DIM = 8, 32
    noise_level = jax.random.uniform(k0, (B,), dtype=jnp.float32, minval=1e-4, maxval=1.0)
    out = jax.block_until_ready(pe(noise_level, dim=DIM))
    ref = _reference(noise_level, DIM)
    assert out.shape == (B, DIM)
    assert jnp.allclose(out, ref, atol=1e-5, rtol=1e-5), "packed path mismatch vs reference"

    # Wide fallback path: dim=128 -> G=1 (already lane-dense).
    B2, DIM2 = 16, 128
    noise_level2 = jax.random.uniform(k1, (B2,), dtype=jnp.float32, minval=1e-4, maxval=1.0)
    out2 = jax.block_until_ready(pe(noise_level2, dim=DIM2))
    ref2 = _reference(noise_level2, DIM2)
    assert out2.shape == (B2, DIM2)
    assert jnp.allclose(out2, ref2, atol=1e-5, rtol=1e-5), "wide path mismatch vs reference"

    print("KERNEL_OK")
</pallas_src>

<mosaic_0001>
module attributes {stable_mosaic.version = 11 : i64} {
  func.func @_pos_enc_kernel_packed(%arg0: i32, %arg1: memref<8x4xf32, #tpu.memory_space<vmem>>, %arg2: memref<4x128xf32, #tpu.memory_space<vmem>>, %arg3: memref<1x128xf32, #tpu.memory_space<vmem>>, %arg4: memref<8x128xf32, #tpu.memory_space<vmem>>) attributes {dimension_semantics = [#tpu.dimension_semantics<parallel>], iteration_bounds = array<i64: 1>, scalar_prefetch = 0 : i64, scratch_operands = 0 : i64, tpu.core_type = #tpu.core_type<tc>, window_params = [{transform_indices = @transform_0, window_bounds = array<i64: 8, 4>}, {pipeline_mode = #tpu.pipeline_mode<synchronous>, transform_indices = @transform_1, window_bounds = array<i64: 4, 128>}, {pipeline_mode = #tpu.pipeline_mode<synchronous>, transform_indices = @transform_2, window_bounds = array<i64: 1, 128>}, {transform_indices = @transform_3, window_bounds = array<i64: 8, 128>}]} {
    %c0 = arith.constant 0 : index
    %c0_0 = arith.constant 0 : index
    %0 = vector.load %arg1[%c0, %c0_0] : memref<8x4xf32, #tpu.memory_space<vmem>>, vector<8x4xf32>
    %c0_1 = arith.constant 0 : index
    %c0_2 = arith.constant 0 : index
    %1 = vector.load %arg2[%c0_1, %c0_2] : memref<4x128xf32, #tpu.memory_space<vmem>>, vector<4x128xf32>
    %cst = arith.constant dense<0.000000e+00> : vector<8x128xf32>
    %2 = tpu.matmul %0, %1, %cst {dimension_numbers = #tpu.dot_dimension_numbers<[1], [0], [0], [1], [0, 0, 1, 1], [], []>} : vector<8x4xf32>, vector<4x128xf32>, vector<8x128xf32> -> vector<8x128xf32>
    %c0_3 = arith.constant 0 : index
    %c0_4 = arith.constant 0 : index
    %3 = vector.load %arg3[%c0_3, %c0_4] : memref<1x128xf32, #tpu.memory_space<vmem>>, vector<1x128xf32>
    %4 = vector.broadcast %3 : vector<1x128xf32> to vector<8x128xf32>
    %5 = arith.addf %2, %4 : vector<8x128xf32>
    %6 = math.sin %5 : vector<8x128xf32>
    %c0_5 = arith.constant 0 : index
    %c0_6 = arith.constant 0 : index
    %7 = vector.load %arg4[%c0_5, %c0_6] : memref<8x128xf32, #tpu.memory_space<vmem>>, vector<8x128xf32>
    tpu.vector_store %arg4[%c0_5, %c0_6], %6 {strides = array<i32>} : memref<8x128xf32, #tpu.memory_space<vmem>>, vector<8x128xf32>,
    return
  }
  func.func @transform_0(%arg0: i32) -> (i32, i32) {
    %c0_i32 = arith.constant 0 : i32
    %c0_i32_0 = arith.constant 0 : i32
    return %arg0, %c0_i32 : i32, i32
  }
  func.func @transform_1(%arg0: i32) -> (i32, i32) {
    %c0_i32 = arith.constant 0 : i32
    %c0_i32_0 = arith.constant 0 : i32
    %c0_i32_1 = arith.constant 0 : i32
    return %c0_i32, %c0_i32_0 : i32, i32
  }
  func.func @transform_2(%arg0: i32) -> (i32, i32) {
    %c0_i32 = arith.constant 0 : i32
    %c0_i32_0 = arith.constant 0 : i32
    %c0_i32_1 = arith.constant 0 : i32
    return %c0_i32, %c0_i32_0 : i32, i32
  }
  func.func @transform_3(%arg0: i32) -> (i32, i32) {
    %c0_i32 = arith.constant 0 : i32
    %c0_i32_0 = arith.constant 0 : i32
    return %arg0, %c0_i32 : i32, i32
  }
}

</mosaic_0001>

<bundles_post_ra>
// kernel: positional_encoding.1
= control target key start
LH: loop header
LB: loop body
LE: loop exit
PB: predicated region body
PF: predicated region fallthrough
CT: control target
= control target key end

     0   :  { %vm24_vm0 = vcmask 1043456   ;;  %vm20_vm1 = vcmask 31744   ;;  %v221_v16 = vmov 683565275   ;;  %v222_v18 = vmov 2475754826   ;;  %s316_s1 = inlined_call_operand.vmem [shape: f32[4,128], index: 1, kind: input, shape index: {}]   ;;  %s317_s0 = inlined_call_operand.vmem [shape: f32[8,4], index: 0, kind: input, shape index: {}]   ;;  %s318_s2 = inlined_call_operand.vmem [shape: f32[1,128], index: 2, kind: input, shape index: {}]   ;;  %s319_s3 = inlined_call_operand.vmem [shape: f32[8,128], index: 3, kind: output, shape index: {}]  }
   0x1   :  { %v15_v0 = vld [vmem:[%s316_s1] sm:$0xf]  ;;  %v223_v21 = vmov 2131351028   ;;  %v224_v24 = vmov 2102212464  }
   0x2   :  { %v14_v1 = vld [vmem:[%s317_s0] sm:$0xff]  ;;  %208 = vmatpush.msk.msra.mxu0 %vm24_vm0, %v15_v0  ;;  %v225_v27 = vmov 920167782   ;;  %v226_v30 = vmov 1326507024   ;;  %v227_v0 = vmov 0  }
   0x3   :  { %209 = vmatmul.msk.f32.vlgmr.msra.gmra.mxu0 %vm20_vm1, %v14_v1  ;;  %v220_v2 = vld [vmem:[%s318_s2] ss:$0 sm:$0xff] }
  0x80   :  { %v45_v3 = vpop.f32.mrf.mxu0 }
  0x81   :  { %v257_v4 = vadd.f32 %v220_v2, %v45_v3 }
  0x83   :  { %v51_v5 = vand.u32 2139095040, %v257_v4  ;;  %v48_v8 = vand.u32 2147483647, %v257_v4  ;;  %vm50_vm14 = vcmp.lt.s32.totalorder %v257_v4, 0 }
  0x85   :  { %v52_v6 = vshrl.u32 %v51_v5, 23  ;;  %v55_v10 = vand.u32 8388607, %v48_v8  ;;  %vm49_vm15 = vcmp.le.f32.partialorder %v48_v8, 0.7853982 }
  0x87   :  { %v210_v7 = vadd.s32 4294967169, %v52_v6  ;;  %v56_v14 = vor.u32 8388608, %v55_v10 }
  0x89   :  { %v58_v9 = vadd.s32 1, %v210_v7  ;;  %v274_v37 = vshll.u32 %v56_v14, 8 }
  0x8b   :  { %vm59_vm2 = vcmp.gt.s32.totalorder %v58_v9, 0  ;;  %v97_v46 = vand.u32 65535, %v274_v37  ;;  %v98_v47 = vshrl.u32 %v274_v37, 16 }
  0x8c   :  { %v60_v11 = vsel %vm59_vm2, %v58_v9, 0 }
  0x8d   :  { %v62_v12 = vand.u32 31, %v60_v11  ;;  %v265_v15 = vshrl.u32 %v60_v11, 5 }
  0x8f   :  { %v263_v13 = vsub.s32 32, %v62_v12  ;;  %v65_v17 = vshll.u32 %v221_v16, %v62_v12  ;;  %v68_v19 = vshll.u32 %v222_v18, %v62_v12  ;;  %v71_v23 = vshll.u32 %v223_v21, %v62_v12 }
  0x90   :  { %v74_v26 = vshll.u32 %v224_v24, %v62_v12  ;;  %v77_v29 = vshll.u32 %v225_v27, %v62_v12  ;;  %vm80_vm3 = vcmp.lt.s32.totalorder %v265_v15, 1  ;;  %vm83_vm4 = vcmp.lt.s32.totalorder %v265_v15, 4 }
  0x91   :  { %v66_v20 = vshrl.u32 %v222_v18, %v263_v13  ;;  %v69_v22 = vshrl.u32 %v223_v21, %v263_v13  ;;  %v72_v25 = vshrl.u32 %v224_v24, %v263_v13  ;;  %v75_v28 = vshrl.u32 %v225_v27, %v263_v13 }
  0x92   :  { %v78_v31 = vshrl.u32 %v226_v30, %v263_v13  ;;  %vm82_vm5 = vcmp.lt.s32.totalorder %v265_v15, 3  ;;  %vm81_vm6 = vcmp.lt.s32.totalorder %v265_v15, 2  ;;  %v64_v11 = vshrl.u32 %v221_v16, %v263_v13 }
  0x93   :  { %v67_v32 = vor.u32 %v66_v20, %v65_v17  ;;  %v70_v33 = vor.u32 %v69_v22, %v68_v19  ;;  %v73_v34 = vor.u32 %v72_v25, %v71_v23  ;;  %v76_v35 = vor.u32 %v75_v28, %v74_v26 }
  0x94   :  { %v79_v36 = vor.u32 %v78_v31, %v77_v29 }
  0x95   :  { %v88_v38 = vsel %vm80_vm3, %v67_v32, %v70_v33  ;;  %v92_v39 = vsel %vm80_vm3, %v70_v33, %v73_v34  ;;  %v89_v40 = vsel %vm83_vm4, %v76_v35, 920167782  ;;  %v85_v7 = vsel %vm83_vm4, %v73_v34, 2102212464 }
  0x96   :  { %v93_v41 = vsel %vm83_vm4, %v79_v36, 1326507024  ;;  %v90_v42 = vsel %vm82_vm5, %v73_v34, %v89_v40  ;;  %v84_v20 = vsel %vm80_vm3, %v64_v11, %v67_v32  ;;  %v86_v21 = vsel %vm82_vm5, %v70_v33, %v85_v7 }
  0x97   :  { %v94_v43 = vsel %vm82_vm5, %v76_v35, %v93_v41  ;;  %v91_v44 = vsel %vm81_vm6, %v88_v38, %v90_v42  ;;  %v87_v13 = vsel %vm81_vm6, %v84_v20, %v86_v21  ;;  %vm191_vm3 = vweird.f32 %v257_v4 }
  0x98   :  { %v95_v45 = vsel %vm81_vm6, %v92_v39, %v94_v43  ;;  %v121_v50 = vand.u32 65535, %v91_v44  ;;  %v122_v51 = vshrl.u32 %v91_v44, 16  ;;  %v141_v29 = vmul.u32 %v274_v37, %v87_v13 }
  0x99   :  { %v99_v48 = vand.u32 65535, %v95_v45  ;;  %v100_v49 = vshrl.u32 %v95_v45, 16 }
  0x9a   :  { %v124_v54 = vmul.u32 %v122_v51, %v97_v46  ;;  %v125_v55 = vmul.u32 %v121_v50, %v98_v47  ;;  %v123_v59 = vmul.u32 %v121_v50, %v97_v46  ;;  %v126_v63 = vmul.u32 %v122_v51, %v98_v47 }
  0x9b   :  { %v102_v52 = vmul.u32 %v100_v49, %v97_v46  ;;  %v103_v53 = vmul.u32 %v99_v48, %v98_v47  ;;  %v101_v56 = vmul.u32 %v99_v48, %v97_v46  ;;  %v104_v58 = vmul.u32 %v100_v49, %v98_v47 }
  0x9c   :  { %v127_v60 = vshll.u32 %v124_v54, 16  ;;  %v129_v2 = vshll.u32 %v125_v55, 16  ;;  %v128_v18 = vshrl.u32 %v124_v54, 16  ;;  %v130_v24 = vshrl.u32 %v125_v55, 16 }
  0x9d   :  { %v105_v57 = vshll.u32 %v102_v52, 16  ;;  %v107_v61 = vshll.u32 %v103_v53, 16  ;;  %v106_v12 = vshrl.u32 %v102_v52, 16  ;;  %v108_v22 = vshrl.u32 %v103_v53, 16 }
  0x9e   :  { %vm131_vm8 = vc.u32 %v123_v59, %v127_v60  ;;  %v133_v3 = vadd.s32 %v127_v60, %v123_v59 }
  0x9f   :  { %vm109_vm7 = vc.u32 %v101_v56, %v105_v57  ;;  %v111_v62 = vadd.s32 %v105_v57, %v101_v56  ;;  %v132_v6 = vsel %vm131_vm8, 1, %v227_v0 }
  0xa0   :  { %v110_v1 = vsel %vm109_vm7, 1, %v227_v0  ;;  %v134_v10 = vadd.s32 %v132_v6, %v126_v63  ;;  %vm135_vm10 = vc.u32 %v133_v3, %v129_v2  ;;  %v137_v27 = vadd.s32 %v133_v3, %v129_v2 }
  0xa1   :  { %v112_v5 = vadd.s32 %v110_v1, %v104_v58  ;;  %vm113_vm9 = vc.u32 %v111_v62, %v107_v61  ;;  %v136_v17 = vsel %vm135_vm10, 1, %v227_v0 }
  0xa2   :  { %v114_v9 = vsel %vm113_vm9, 1, %v227_v0  ;;  %v138_v19 = vadd.s32 %v136_v17, %v134_v10 }
  0xa3   :  { %v116_v14 = vadd.s32 %v114_v9, %v112_v5 }
  0xa4   :  { %v139_v25 = vadd.s32 %v138_v19, %v128_v18 }
  0xa5   :  { %v117_v23 = vadd.s32 %v116_v14, %v106_v12 }
  0xa6   :  { %v140_v16 = vadd.s32 %v139_v25, %v130_v24 }
  0xa7   :  { %v118_v26 = vadd.s32 %v117_v23, %v108_v22 }
  0xa8   :  { %v144_v28 = vadd.s32 1, %v140_v16 }
  0xa9   :  { %vm143_vm11 = vc.u32 %v118_v26, %v137_v27  ;;  %v142_v15 = vadd.s32 %v137_v27, %v118_v26 }
  0xaa   :  { %v145_v30 = vsel %vm143_vm11, %v144_v28, %v140_v16 }
  0xab   :  { %v146_v31 = vadd.s32 %v145_v30, %v141_v29 }
  0xad   :  { %v147_v32 = vadd.s32 536870912, %v146_v31 }
  0xaf   :  { %v148_v34 = vshrl.u32 %v147_v32, 30 }
  0xb1   :  { %v149_v35 = vshll.u32 %v148_v34, 30  ;;  %v172_v54 = vsub.s32 4, %v148_v34 }
  0xb3   :  { %v150_v33 = vsub.s32 %v146_v31, %v149_v35  ;;  %v173_v59 = vsel %vm50_vm14, %v172_v54, %v148_v34 }
  0xb4   :  { %v175_v62 = vsel %vm49_vm15, 0, %v173_v59 }
  0xb5   :  { %vm151_vm12 = vcmp.lt.s32.totalorder %v150_v33, 0  ;;  %v152_v36 = vsub.s32 0, %v150_v33  ;;  %v192_v3 = vadd.s32 3, %v175_v62 }
  0xb7   :  { %v153_v38 = vsel %vm151_vm12, %v152_v36, %v150_v33  ;;  %v193_v9 = vand.u32 3, %v192_v3 }
  0xb8   :  { %v154_v39 = vclz %v153_v38 }
  0xb9   :  { %vm195_vm0 = vcmp.eq.s32.totalorder %v193_v9, 0  ;;  %vm198_vm1 = vcmp.eq.s32.totalorder %v193_v9, 2  ;;  %vm194_vm2 = vcmp.lt.s32.totalorder %v193_v9, 2 }
  0xba   :  { %v211_v40 = vadd.s32 4294967294, %v154_v39 }
  0xbc   :  { %vm212_vm13 = vcmp.lt.s32.totalorder %v211_v40, 0 }
  0xbd   :  { %v157_v41 = vsel %vm212_vm13, 0, %v211_v40 }
  0xbe   :  { %v158_v42 = vsub.s32 32, %v157_v41  ;;  %v162_v43 = vsub.s32 4294967266, %v157_v41  ;;  %v159_v44 = vshll.u32 %v150_v33, %v157_v41 }
  0xc0   :  { %v160_v45 = vshrl.u32 %v142_v15, %v158_v42  ;;  %v163_v46 = vadd.s32 127, %v162_v43 }
  0xc2   :  { %v161_v37 = vor.u32 %v160_v45, %v159_v44  ;;  %v164_v47 = vshll.u32 %v163_v46, 23 }
  0xc4   :  { %v165_v48 = vor.u32 4788187, %v164_v47  ;;  %v168_v50 = vcvt.s32.f32 %v161_v37 }
  0xc6   :  { %v166_v49 = vand.u32 2147483647, %v165_v48 }
  0xc8   :  { %v169_v51 = vmul.f32 %v168_v50, %v166_v49 }
  0xca   :  { %v170_v52 = vxor.u32 2147483648, %v169_v51 }
  0xcc   :  { %v171_v53 = vsel %vm50_vm14, %v170_v52, %v169_v51 }
  0xcd   :  { %v174_v55 = vsel %vm49_vm15, %v257_v4, %v171_v53 }
  0xce   :  { %v176_v56 = vmul.f32 %v174_v55, %v174_v55 }
  0xd0   :  { %v177_v57 = vmul.f32 -0.001358992, %v176_v56  ;;  %v184_v58 = vmul.f32 -0.00019511016, %v176_v56 }
  0xd2   :  { %v178_v60 = vadd.f32 0.041655596, %v177_v57  ;;  %v185_v61 = vadd.f32 0.008332121, %v184_v58 }
  0xd4   :  { %v179_v63 = vmul.f32 %v178_v60, %v176_v56  ;;  %v186_v0 = vmul.f32 %v185_v61, %v176_v56 }
  0xd6   :  { %v180_v1 = vadd.f32 -0.4999988, %v179_v63  ;;  %v187_v2 = vadd.f32 -0.16666654, %v186_v0 }
  0xd8   :  { %v181_v5 = vmul.f32 %v180_v1, %v176_v56  ;;  %v188_v6 = vmul.f32 %v187_v2, %v176_v56 }
  0xda   :  { %v182_v7 = vadd.f32 1.0, %v181_v5  ;;  %v189_v8 = vadd.f32 1.0, %v188_v6 }
  0xdc   :  { %v190_v10 = vmul.f32 %v189_v8, %v174_v55  ;;  %v199_v11 = vxor.u32 2147483648, %v182_v7 }
  0xde   :  { %v196_v12 = vxor.u32 2147483648, %v190_v10  ;;  %v200_v17 = vsel %vm198_vm1, %v199_v11, %v190_v10 }
  0xe0   :  { %v197_v14 = vsel %vm195_vm0, %v182_v7, %v196_v12 }
  0xe1   :  { %v201_v18 = vsel %vm194_vm2, %v197_v14, %v200_v17 }
  0xe2   :  { %v202_v19 = vsel %vm191_vm3, nan, %v201_v18 }
  0xe3   :  { %203 = vst [vmem:[%s319_s3] sm:$0xff] %v202_v19 }

</bundles_post_ra>
